<compile_context>
chip_gen: v6e
topology: v6e:2x2x1
jax: 0.10.0
libtpu: 0.0.40
codegen_flags: <defaults>
</compile_context>

<pallas_src>
import math

import jax
import jax.numpy as jnp
from jax import lax
from jax.experimental import pallas as pl
from jax.experimental.pallas import tpu as pltpu


def _round_up(x, m):
    return ((x + m - 1) // m) * m


def landmark_encoder_kernel(inv_ratio_ref,  # SMEM (B,)  f32  scalar-prefetched 1/framerate_ratio
                            x_ref,          # VMEM (TM, F)  matmul dtype (bf16)
                            w_ref,          # VMEM (F, D)   matmul dtype (bf16), BN folded in
                            bias_ref,       # VMEM (1, D)   f32, shift @ W
                            div_ref,        # VMEM (1, D)   f32, div_term expanded to full width
                            phase_ref,      # VMEM (1, D)   f32, (d & 1) * pi/2
                            o_ref):         # VMEM (TM, D)  f32
    b = pl.program_id(0)          # batch element
    j = pl.program_id(1)          # time-row tile
    tm = o_ref.shape[0]

    # Projection with BatchNorm folded into the weight; f32 accumulation on the MXU.
    y = jnp.dot(x_ref[...], w_ref[...], preferred_element_type=jnp.float32)
    y = y + bias_ref[...]

    # Fractional positional encoding, computed in-kernel:
    #   pos  = (j*TM + row) / framerate_ratio[b]
    #   pe   = sin(pos * div_term_full + phase)   (phase = pi/2 on odd lanes -> cos)
    row = j * tm + lax.broadcasted_iota(jnp.int32, (tm, 1), 0)
    pos = row.astype(jnp.float32) * inv_ratio_ref[b]          # (TM, 1)
    angle = pos * div_ref[...] + phase_ref[...]               # (TM, D)
    pe = jnp.sin(angle)

    o_ref[...] = (y + pe).astype(o_ref.dtype)


def landmark_encoder(data, mask, framerate_ratio, params, *, matmul_dtype=jnp.bfloat16):
    """data: (B, T, *landmark_dims); mask unused (encoder stack omitted)."""
    del mask
    B, T = data.shape[0], data.shape[1]
    x = data.reshape(B, T, -1).astype(jnp.float32)            # view(B, T, -1)
    F = x.shape[-1]

    gamma, beta, r_mean, r_var, eps, w = (
        params["bn_gamma"], params["bn_beta"], params["bn_mean"],
        params["bn_var"], params["bn_eps"], params["proj_w"],
    )
    D = w.shape[1]

    # Fold eval-mode BatchNorm1d into the bias-free Linear:
    #   ((x - mean) * inv_std * gamma + beta) @ W  ==  x @ (scale[:,None]*W) + (shift @ W)
    inv_std = 1.0 / jnp.sqrt(r_var.astype(jnp.float32) + eps)
    scale = gamma.astype(jnp.float32) * inv_std
    shift = beta.astype(jnp.float32) - r_mean.astype(jnp.float32) * scale
    w_folded = (scale[:, None] * w.astype(jnp.float32)).astype(matmul_dtype)   # (F, D)
    bias = (shift @ w.astype(jnp.float32)).reshape(1, D)                        # (1, D) f32

    # PE constants: div_term[d//2] expanded to width D (odd-D safe), phase = (d&1)*pi/2.
    half = jnp.exp(jnp.arange(0, D, 2, dtype=jnp.float32) * -(math.log(10000.0) / D))
    div_full = jnp.repeat(half, 2)[:D].reshape(1, D)
    phase = (jnp.arange(D, dtype=jnp.int32) % 2).astype(jnp.float32).reshape(1, D) * (math.pi / 2.0)

    # Per-batch reciprocal framerate ratio, prefetched into SMEM.
    inv_ratio = (1.0 / framerate_ratio.astype(jnp.float32)).reshape(B)

    # Row-tile the time axis (multiple of 8, up to 512 rows per block).
    TM = min(512, _round_up(T, 8))
    T_pad = _round_up(T, TM)
    if T_pad != T:
        x = jnp.pad(x, ((0, 0), (0, T_pad - T), (0, 0)))
    x = x.astype(matmul_dtype)

    grid = (B, T_pad // TM)

    out = pl.pallas_call(
        landmark_encoder_kernel,
        out_shape=jax.ShapeDtypeStruct((B, T_pad, D), jnp.float32),
        grid_spec=pltpu.PrefetchScalarGridSpec(
            num_scalar_prefetch=1,
            grid=grid,
            in_specs=[
                pl.BlockSpec((None, TM, F), lambda b, j, inv: (b, j, 0)),   # x rows
                pl.BlockSpec((F, D), lambda b, j, inv: (0, 0)),             # folded weight
                pl.BlockSpec((1, D), lambda b, j, inv: (0, 0)),             # bias
                pl.BlockSpec((1, D), lambda b, j, inv: (0, 0)),             # div_term (full width)
                pl.BlockSpec((1, D), lambda b, j, inv: (0, 0)),             # phase
            ],
            out_specs=pl.BlockSpec((None, TM, D), lambda b, j, inv: (b, j, 0)),
        ),
        compiler_params=pltpu.CompilerParams(
            dimension_semantics=("parallel", "parallel")),
    )(inv_ratio, x, w_folded, bias, div_full, phase)

    if T_pad != T:
        out = out[:, :T]
    return out


def _reference(data, framerate_ratio, params):
    """Pure-JAX reference mirroring the PyTorch forward (minus the encoder stack)."""
    B, T = data.shape[0], data.shape[1]
    x = data.reshape(B, T, -1).astype(jnp.float32)
    g, b, m, v, eps, w = (params["bn_gamma"], params["bn_beta"], params["bn_mean"],
                          params["bn_var"], params["bn_eps"], params["proj_w"])
    D = w.shape[1]
    xn = (x - m) / jnp.sqrt(v + eps) * g + b
    y = xn @ w
    position = (jnp.arange(T, dtype=jnp.float32)[None, :]
                / framerate_ratio.astype(jnp.float32)[:, None])[..., None]     # (B, T, 1)
    div_term = jnp.exp(jnp.arange(0, D, 2, dtype=jnp.float32) * -(math.log(10000.0) / D))
    pe = jnp.zeros((B, T, D), jnp.float32)
    pe = pe.at[:, :, 0::2].set(jnp.sin(position * div_term))
    pe = pe.at[:, :, 1::2].set(jnp.cos(position * div_term))
    return y + pe


if __name__ == "__main__":
    key = jax.random.PRNGKey(0)
    B, T = 2, 16                 # T == max_data_length so data + pe shapes match
    n_landmarks, coord = 4, 3    # data.view(B, T, -1) -> F = 12
    F = n_landmarks * coord
    D = 32                       # latent_dim

    k1, k2, k3, k4, k5, k6 = jax.random.split(key, 6)
    data = jax.random.normal(k1, (B, T, n_landmarks, coord), dtype=jnp.float32)
    mask = jnp.ones((B, T), dtype=jnp.float32)
    framerate_ratio = jnp.array([1.0, 2.0], dtype=jnp.float32)

    params = {
        "bn_gamma": jax.random.normal(k2, (F,), dtype=jnp.float32) * 0.1 + 1.0,
        "bn_beta": jax.random.normal(k3, (F,), dtype=jnp.float32) * 0.1,
        "bn_mean": jax.random.normal(k4, (F,), dtype=jnp.float32) * 0.1,
        "bn_var": jax.nn.softplus(jax.random.normal(k5, (F,), dtype=jnp.float32)) + 0.5,
        "bn_eps": 1e-5,
        "proj_w": jax.random.normal(k6, (F, D), dtype=jnp.float32) / math.sqrt(F),
    }

    ref = _reference(data, framerate_ratio, params)

    # Default path: bf16 matmul operands (v6e-friendly), f32 accumulation / PE math.
    out = landmark_encoder(data, mask, framerate_ratio, params)
    out = jax.block_until_ready(out)
    assert out.shape == (B, T, D)
    assert jnp.allclose(out, ref, atol=5e-2, rtol=5e-2), float(jnp.max(jnp.abs(out - ref)))

    # Tight numerical check with f32 matmul operands (matches module math closely).
    out_f32 = landmark_encoder(data, mask, framerate_ratio, params, matmul_dtype=jnp.float32)
    out_f32 = jax.block_until_ready(out_f32)
    assert jnp.allclose(out_f32, ref, atol=1e-4, rtol=1e-4), float(jnp.max(jnp.abs(out_f32 - ref)))

    print("KERNEL_OK")
</pallas_src>

<mosaic_0001>
module attributes {stable_mosaic.version = 11 : i64} {
  func.func @landmark_encoder_kernel(%arg0: i32, %arg1: i32, %arg2: memref<2xf32, #tpu.memory_space<smem>>, %arg3: memref<1x16x12xbf16, #tpu.memory_space<vmem>>, %arg4: memref<12x32xbf16, #tpu.memory_space<vmem>>, %arg5: memref<1x32xf32, #tpu.memory_space<vmem>>, %arg6: memref<1x32xf32, #tpu.memory_space<vmem>>, %arg7: memref<1x32xf32, #tpu.memory_space<vmem>>, %arg8: memref<1x16x32xf32, #tpu.memory_space<vmem>>) attributes {dimension_semantics = [#tpu.dimension_semantics<parallel>, #tpu.dimension_semantics<parallel>], iteration_bounds = array<i64: 2, 1>, scalar_prefetch = 1 : i64, scratch_operands = 0 : i64, tpu.core_type = #tpu.core_type<tc>, window_params = [{transform_indices = @transform_0, window_bounds = array<i64: 1, 16, 12>}, {pipeline_mode = #tpu.pipeline_mode<synchronous>, transform_indices = @transform_1, window_bounds = array<i64: 12, 32>}, {pipeline_mode = #tpu.pipeline_mode<synchronous>, transform_indices = @transform_2, window_bounds = array<i64: 1, 32>}, {pipeline_mode = #tpu.pipeline_mode<synchronous>, transform_indices = @transform_3, window_bounds = array<i64: 1, 32>}, {pipeline_mode = #tpu.pipeline_mode<synchronous>, transform_indices = @transform_4, window_bounds = array<i64: 1, 32>}, {transform_indices = @transform_5, window_bounds = array<i64: 1, 16, 32>}]} {
    %c0 = arith.constant 0 : index
    %c0_0 = arith.constant 0 : index
    %c0_1 = arith.constant 0 : index
    %0 = vector.load %arg3[%c0, %c0_0, %c0_1] : memref<1x16x12xbf16, #tpu.memory_space<vmem>>, vector<1x16x12xbf16>
    %1 = vector.shape_cast %0 : vector<1x16x12xbf16> to vector<16x12xbf16>
    %c0_2 = arith.constant 0 : index
    %c0_3 = arith.constant 0 : index
    %2 = vector.load %arg4[%c0_2, %c0_3] : memref<12x32xbf16, #tpu.memory_space<vmem>>, vector<12x32xbf16>
    %cst = arith.constant dense<0.000000e+00> : vector<16x32xf32>
    %3 = tpu.matmul %1, %2, %cst {dimension_numbers = #tpu.dot_dimension_numbers<[1], [0], [0], [1], [0, 0, 1, 1], [], []>} : vector<16x12xbf16>, vector<12x32xbf16>, vector<16x32xf32> -> vector<16x32xf32>
    %c0_4 = arith.constant 0 : index
    %c0_5 = arith.constant 0 : index
    %4 = vector.load %arg5[%c0_4, %c0_5] : memref<1x32xf32, #tpu.memory_space<vmem>>, vector<1x32xf32>
    %5 = vector.broadcast %4 : vector<1x32xf32> to vector<16x32xf32>
    %6 = arith.addf %3, %5 : vector<16x32xf32>
    %c16_i32 = arith.constant 16 : i32
    %7 = arith.muli %arg1, %c16_i32 : i32
    %8 = tpu.iota {dimensions = array<i32: 0>} : vector<16x1xi32>
    %9 = vector.broadcast %7 : i32 to vector<16x1xi32>
    %10 = arith.addi %9, %8 : vector<16x1xi32>
    %11 = arith.sitofp %10 : vector<16x1xi32> to vector<16x1xf32>
    %12 = arith.index_cast %arg0 : i32 to index
    %13 = memref.load %arg2[%12] : memref<2xf32, #tpu.memory_space<smem>>
    %14 = vector.broadcast %13 : f32 to vector<16x1xf32>
    %15 = arith.mulf %11, %14 : vector<16x1xf32>
    %c0_6 = arith.constant 0 : index
    %c0_7 = arith.constant 0 : index
    %16 = vector.load %arg6[%c0_6, %c0_7] : memref<1x32xf32, #tpu.memory_space<vmem>>, vector<1x32xf32>
    %17 = vector.broadcast %15 : vector<16x1xf32> to vector<16x32xf32>
    %18 = vector.broadcast %16 : vector<1x32xf32> to vector<16x32xf32>
    %19 = arith.mulf %17, %18 : vector<16x32xf32>
    %c0_8 = arith.constant 0 : index
    %c0_9 = arith.constant 0 : index
    %20 = vector.load %arg7[%c0_8, %c0_9] : memref<1x32xf32, #tpu.memory_space<vmem>>, vector<1x32xf32>
    %21 = vector.broadcast %20 : vector<1x32xf32> to vector<16x32xf32>
    %22 = arith.addf %19, %21 : vector<16x32xf32>
    %23 = math.sin %22 : vector<16x32xf32>
    %24 = arith.addf %6, %23 : vector<16x32xf32>
    %c0_10 = arith.constant 0 : index
    %c0_11 = arith.constant 0 : index
    %c0_12 = arith.constant 0 : index
    %25 = vector.load %arg8[%c0_10, %c0_11, %c0_12] : memref<1x16x32xf32, #tpu.memory_space<vmem>>, vector<1x16x32xf32>
    %26 = vector.shape_cast %25 : vector<1x16x32xf32> to vector<16x32xf32>
    %27 = vector.shape_cast %24 : vector<16x32xf32> to vector<1x16x32xf32>
    tpu.vector_store %arg8[%c0_10, %c0_11, %c0_12], %27 {strides = array<i32>} : memref<1x16x32xf32, #tpu.memory_space<vmem>>, vector<1x16x32xf32>,
    return
  }
  func.func @transform_0(%arg0: i32, %arg1: i32, %arg2: memref<2xf32, #tpu.memory_space<smem>>) -> (i32, i32, i32) {
    %c0_i32 = arith.constant 0 : i32
    %c0_i32_0 = arith.constant 0 : i32
    return %arg0, %arg1, %c0_i32 : i32, i32, i32
  }
  func.func @transform_1(%arg0: i32, %arg1: i32, %arg2: memref<2xf32, #tpu.memory_space<smem>>) -> (i32, i32) {
    %c0_i32 = arith.constant 0 : i32
    %c0_i32_0 = arith.constant 0 : i32
    %c0_i32_1 = arith.constant 0 : i32
    return %c0_i32, %c0_i32_0 : i32, i32
  }
  func.func @transform_2(%arg0: i32, %arg1: i32, %arg2: memref<2xf32, #tpu.memory_space<smem>>) -> (i32, i32) {
    %c0_i32 = arith.constant 0 : i32
    %c0_i32_0 = arith.constant 0 : i32
    %c0_i32_1 = arith.constant 0 : i32
    return %c0_i32, %c0_i32_0 : i32, i32
  }
  func.func @transform_3(%arg0: i32, %arg1: i32, %arg2: memref<2xf32, #tpu.memory_space<smem>>) -> (i32, i32) {
    %c0_i32 = arith.constant 0 : i32
    %c0_i32_0 = arith.constant 0 : i32
    %c0_i32_1 = arith.constant 0 : i32
    return %c0_i32, %c0_i32_0 : i32, i32
  }
  func.func @transform_4(%arg0: i32, %arg1: i32, %arg2: memref<2xf32, #tpu.memory_space<smem>>) -> (i32, i32) {
    %c0_i32 = arith.constant 0 : i32
    %c0_i32_0 = arith.constant 0 : i32
    %c0_i32_1 = arith.constant 0 : i32
    return %c0_i32, %c0_i32_0 : i32, i32
  }
  func.func @transform_5(%arg0: i32, %arg1: i32, %arg2: memref<2xf32, #tpu.memory_space<smem>>) -> (i32, i32, i32) {
    %c0_i32 = arith.constant 0 : i32
    %c0_i32_0 = arith.constant 0 : i32
    return %arg0, %arg1, %c0_i32 : i32, i32, i32
  }
}

</mosaic_0001>

<bundles_post_ra>
// kernel: tpu_custom_call.1
= control target key start
LH: loop header
LB: loop body
LE: loop exit
PB: predicated region body
PF: predicated region fallthrough
CT: control target
= control target key end

     0   :  { %s1199_s0 = inlined_call_operand.vmem [shape: f32[2], index: 0, kind: input, shape index: {}]   ;;  %s1200_s1 = inlined_call_operand.vmem [shape: bf16[2,16,12], index: 1, kind: input, shape index: {}]   ;;  %s1201_s2 = inlined_call_operand.vmem [shape: bf16[12,32], index: 2, kind: input, shape index: {}]   ;;  %s1202_s3 = inlined_call_operand.vmem [shape: f32[1,32], index: 3, kind: input, shape index: {}]   ;;  %s1203_s4 = inlined_call_operand.vmem [shape: f32[1,32], index: 4, kind: input, shape index: {}]   ;;  %s1204_s5 = inlined_call_operand.vmem [shape: f32[1,32], index: 5, kind: input, shape index: {}]   ;;  %s1205_s6 = inlined_call_operand.hbm [shape: f32[2,16,32], index: 6, kind: output, shape index: {}]  }
   0x1   :  { %s11_s23 = sshll.u32 %s1199_s0, 4  ;;  %s12_s23 = int_to_ptr.vmem [resolvable:$true] %s11_s23 }
   0x2   :  { %s792_s24 = scalar_lea.vmem %s12_s23, 16  ;;  %p797_p1 = scmp.lt.s32.totalorder %s12_s23, %s12_s23 }
   0x3   :  { %p793_p0 = scmp.ne.s32.totalorder %s12_s23, %s792_s24  ;;  %p798_p2 = scmp.lt.s32.totalorder %s792_s24, %s792_s24 }
   0x5   :  { %p799_p3 = por %p798_p2, %p797_p1 }
   0x7   :  { %p800_p4 = pnand %p799_p3, %p793_p0 }
   0x9   :  { %803 = shalt.err (!%p800_p4)  }
   0xa   :  { %s884_s25 = smov [#allocation3]  }
   0xb   :  { %14 = dma.vmem_to_smem %s12_s23, 16, %s884_s25, [#allocation2] }
   0xc   :  { %854 = dma.done.wait [#allocation2], 16 }
   0xd   :  { %855 = vsyncadd [#allocation2], 4294967280 }
   0xe   :  { %16 = sfence }
   0xf   :  { %17 = vsyncpa [#allocation5], 0 }
  0x10   :  { %19 = vsyncpa [#allocation5 + $0x1], 0  ;;  %s934_s26 = smov 0   ;;  %s936_s27 = smov 0  }
  0x11   :  { %s938_s0 = smov 0   ;;  %s940_s28 = smov 0  }
  0x12   :  { %s942_s29 = smov 0   ;;  %s944_s30 = smov 0  }
  0x13 LB: > { %s671_s7 = sadd.s32 4294967295, %s882_s30   ;;  %s672_s8 = sadd.s32 4294967294, %s882_s30   ;;  %s882_s30 = sphi %s944_s30, %s25_s30   ;;  %s878_s29 = sphi %s942_s29, %s1216_s29   ;;  %s874_s28 = sphi %s940_s28, %s1215_s28   ;;  %s870_s0 = sphi %s938_s0, %s1214_s0   ;;  %s866_s27 = sphi %s936_s27, %s1213_s27   ;;  %s862_s26 = sphi %s934_s26, %s1212_s26  }
  0x14   : > { %s37_s9 = sadd.s32 1, %s878_s29  ;;  %s158_s10 = sadd.s32 1, %s870_s0 }
  0x15   : > { %p39_p5 = scmp.ge.s32.totalorder %s37_s9, 2  ;;  %p168_p6 = scmp.ne.s32.totalorder %s870_s0, %s866_s27 }
  0x16   : > { %p169_p7 = scmp.eq.s32.totalorder %s671_s7, 1  ;;  %p174_p8 = scmp.ne.s32.totalorder %s866_s27, %s862_s26 }
  0x17   : > { %s1218_s9 = smov (%p39_p5, %s37_s9), 0  ;;  %p175_p10 = scmp.eq.s32.totalorder %s672_s8, 1 }
  0x18   : > { %p974_p9 = por %p169_p7, %p168_p6  ;;  %s153_s12 = ssub.s32 %s878_s29, %s1218_s9 }
  0x19   : > { %p675_p11 = scmp.ge.s32.totalorder %s882_s30, 1  ;;  %p156_p12 = scmp.eq.s32.totalorder %s153_s12, 0 }
  0x1a   : > { %p981_p13 = por %p175_p10, %p174_p8  ;;  %p218_p0 = scmp.lt.s32.totalorder %s882_s30, 3 }
  0x1b   : > { %s987_s14 = scalar_select %p156_p12, %s870_s0, %s158_s10  }
  0x1c   : > { %p219_p1 = pnand %p675_p11, %p218_p0 }
  0x1d   : > { %p251_p2 = scmp.lt.s32.totalorder (!%p219_p1), %s874_s28, 1  ;;  %s341_s22 = sld [smem:[#allocation3 + %s874_s28]] (!%p219_p1) }
  0x1e   : > { %222 = sbr.rel (%p219_p1) target bundleno = 255 (0xff), region = 40  ;;  %s247_s8 = sand.u32 (!%p219_p1), 1, %s866_s27  }
  0x1f   : > { %s676_s15 = sshll.u32 (!%p219_p1), %s247_s8, 4  ;;  %s893_s23 = smov (!%p219_p1), [#allocation4]  }
  0x20   : > { %s249_s16 = scalar_lea.vmem (!%p219_p1), [#allocation4], %s676_s15  ;;  %s808_s24 = sshll.u32 (!%p219_p1), %s893_s23, 4  ;;  %s809_s24 = int_to_ptr.vmem [resolvable:$false] %s808_s24 }
  0x21   : > { %s810_s25 = scalar_lea.vmem (!%p219_p1), %s809_s24, 512 }
  0x23   : > { %vm287_vm0 = vcmask 1045504   ;;  %v885_v0 = vmov 0.0   ;;  %v782_v1 = vld [vmem:[%s1201_s2] sm:$0x3f]   ;;  %vm886_vm1 = vmmov 0   ;;  %s252_s17 = scalar_select %p251_p2, %s874_s28, 1  ;;  %v333_v4 = vlaneseq }
  0x24   : > { %702 = vmatprep.subr.bf16.mxu0 %v885_v0  ;;  %704 = vmatprep.mubr.msk.bf16.mxu0 %vm886_vm1, %v885_v0  ;;  %v289_v2 = vsel %vm287_vm0, %v782_v1, 0  ;;  %vm283_vm2 = vcmask 97280   ;;  %v342_v8 = vstv %s341_s22  ;;  %v683_v11 = vld [vmem:[%s1203_s4] ss:$0 sm:$0xff]  ;;  %v887_v33 = vmov 2102212464  }
  0x25   : > { %703 = vmatpush3.bf16.msra.mxu0 %v289_v2  ;;  %s698_s18 = sshll.u32 %s252_s17, 3  ;;  %v334_v5 = vshrl.u32 %v333_v4, 7  ;;  %v684_v14 = vld [vmem:[%s1204_s5] ss:$0 sm:$0xff]  ;;  %v888_v35 = vmov 920167782  }
  0x26   : > { %s258_s21 = scalar_lea.vmem %s1200_s1, %s698_s18  ;;  %v889_v38 = vmov 683565275   ;;  %v890_v40 = vmov 2475754826   ;;  %v891_v43 = vmov 1326507024  }
  0x27   : > { %v783_v3 = vld [vmem:[%s258_s21] sm:$0xff]   ;;  %v339_v6 = vcvt.s32.f32 %v334_v5  ;;  %v335_v7 = vadd.s32 8, %v334_v5  ;;  %v892_v46 = vmov 2131351028   ;;  %s592_s17 = sshll.u32 %s249_s16, 4  ;;  %s699_s18 = sshll.u32 %s874_s28, 8  ;;  %s1152_s17 = int_to_ptr.vmem [resolvable:$true] %s592_s17 }
  0x28   : > { %705 = vmatmul.mubr.msk.bf16.vlgmr.msra.gmra.mxu0 %vm283_vm2, %v783_v3  ;;  %s1150_s21 = scalar_lea.hbm %s1205_s6, %s699_s18  ;;  %s1154_s22 = scalar_lea.sflag [#allocation5], %s247_s8 }
  0x29   : > { %v343_v9 = vmul.f32 %v342_v8, %v339_v6  ;;  %v340_v10 = vcvt.s32.f32 %v335_v7  ;;  %s804_s28 = scalar_lea.vmem %s1152_s17, 256  ;;  %p811_p6 = scmp.lt.s32.totalorder %s1152_s17, %s809_s24 }
  0x2a   : > { %p805_p3 = scmp.ne.s32.totalorder %s1152_s17, %s804_s28  ;;  %p812_p7 = scmp.lt.s32.totalorder %s810_s25, %s804_s28 }
  0x2b   : > { %v352_v12 = vmul.f32 %v683_v11, %v343_v9  ;;  %v344_v13 = vmul.f32 %v342_v8, %v340_v10 }
  0x2c   : > { %p806_p4 = pnand %p805_p3, %p974_p9  ;;  %p813_p8 = por %p812_p7, %p811_p6 }
  0x2d   : > { %v1004_v15 = vadd.f32 %v684_v14, %v352_v12  ;;  %v353_v16 = vmul.f32 %v683_v11, %v344_v13 }
  0x2e   : > { %p807_p5 = pneg %p806_p4 }
  0x2f   : > { %v366_v17 = vand.u32 2139095040, %v1004_v15  ;;  %v1007_v18 = vadd.f32 %v684_v14, %v353_v16  ;;  %v363_v31 = vand.u32 2147483647, %v1004_v15  ;;  %vm365_vm1 = vcmp.lt.s32.totalorder %v1004_v15, 0 }
  0x30   : > { %p814_p10 = pnand %p813_p8, %p807_p5 }
  0x31   : > { %v367_v19 = vshrl.u32 %v366_v17, 23  ;;  %v470_v20 = vand.u32 2139095040, %v1007_v18  ;;  %v370_v50 = vand.u32 8388607, %v363_v31  ;;  %v467_v51 = vand.u32 2147483647, %v1007_v18 }
  0x32   : > { %vm1119_vm2 = vcmp.le.f32.partialorder %v363_v31, 0.7853982 }
  0x33   : > { %v685_v21 = vadd.s32 4294967169, %v367_v19  ;;  %v471_v22 = vshrl.u32 %v470_v20, 23  ;;  %v474_v5 = vand.u32 8388607, %v467_v51  ;;  %v371_v7 = vor.u32 8388608, %v370_v50 }
  0x35   : > { %v373_v23 = vadd.s32 1, %v685_v21  ;;  %v689_v24 = vadd.s32 4294967169, %v471_v22  ;;  %v411_v20 = vshll.u32 %v371_v7, 8  ;;  %v475_v21 = vor.u32 8388608, %v474_v5 }
  0x37   : > { %vm374_vm3 = vcmp.gt.s32.totalorder %v373_v23, 0  ;;  %v477_v25 = vadd.s32 1, %v689_v24 }
  0x38   : > { %v375_v26 = vsel %vm374_vm3, %v373_v23, 0  ;;  %vm469_vm3 = vcmp.lt.s32.totalorder %v1007_v18, 0 }
  0x39   : > { %vm478_vm4 = vcmp.gt.s32.totalorder %v477_v25, 0  ;;  %v377_v27 = vand.u32 31, %v375_v26  ;;  %v1013_v32 = vshrl.u32 %v375_v26, 5 }
  0x3a   : > { %v479_v28 = vsel %vm478_vm4, %v477_v25, 0  ;;  %vm1129_vm4 = vcmp.le.f32.partialorder %v467_v51, 0.7853982 }
  0x3b   : > { %v1010_v29 = vsub.s32 32, %v377_v27  ;;  %v481_v30 = vand.u32 31, %v479_v28  ;;  %v389_v34 = vshll.u32 %v887_v33, %v377_v27  ;;  %v380_v39 = vshll.u32 %v889_v38, %v377_v27 }
  0x3c   : > { %v392_v42 = vshll.u32 %v888_v35, %v377_v27  ;;  %v383_v45 = vshll.u32 %v890_v40, %v377_v27  ;;  %v386_v48 = vshll.u32 %v892_v46, %v377_v27  ;;  %vm395_vm5 = vcmp.lt.s32.totalorder %v1013_v32, 1 }
  0x3d   : > { %v390_v36 = vshrl.u32 %v888_v35, %v1010_v29  ;;  %v1016_v37 = vsub.s32 32, %v481_v30  ;;  %v381_v41 = vshrl.u32 %v890_v40, %v1010_v29  ;;  %v393_v44 = vshrl.u32 %v891_v43, %v1010_v29 }
  0x3e   : > { %v384_v47 = vshrl.u32 %v892_v46, %v1010_v29  ;;  %v387_v49 = vshrl.u32 %v887_v33, %v1010_v29  ;;  %v1027_v52 = vshrl.u32 %v479_v28, 5  ;;  %vm398_vm6 = vcmp.lt.s32.totalorder %v1013_v32, 4 }
  0x3f   : > { %v391_v53 = vor.u32 %v390_v36, %v389_v34  ;;  %v493_v54 = vshll.u32 %v887_v33, %v481_v30  ;;  %v494_v55 = vshrl.u32 %v888_v35, %v1016_v37  ;;  %v382_v56 = vor.u32 %v381_v41, %v380_v39 }
  0x40   : > { %v394_v57 = vor.u32 %v393_v44, %v392_v42  ;;  %v496_v58 = vshll.u32 %v888_v35, %v481_v30  ;;  %v497_v59 = vshrl.u32 %v891_v43, %v1016_v37  ;;  %v385_v60 = vor.u32 %v384_v47, %v383_v45 }
  0x41   : > { %v388_v61 = vor.u32 %v387_v49, %v386_v48  ;;  %v484_v62 = vshll.u32 %v889_v38, %v481_v30  ;;  %v487_v63 = vshll.u32 %v890_v40, %v481_v30  ;;  %v485_v0 = vshrl.u32 %v890_v40, %v1016_v37 }
  0x42   : > { %v488_v1 = vshrl.u32 %v892_v46, %v1016_v37  ;;  %v490_v2 = vshll.u32 %v892_v46, %v481_v30  ;;  %v491_v3 = vshrl.u32 %v887_v33, %v1016_v37  ;;  %vm397_vm7 = vcmp.lt.s32.totalorder %v1013_v32, 3 }
  0x43   : > { %v404_v4 = vsel %vm398_vm6, %v391_v53, 920167782  ;;  %v495_v6 = vor.u32 %v494_v55, %v493_v54  ;;  %v408_v8 = vsel %vm398_vm6, %v394_v57, 1326507024  ;;  %v498_v9 = vor.u32 %v497_v59, %v496_v58 }
  0x44   : > { %vm502_vm8 = vcmp.lt.s32.totalorder %v1027_v52, 4  ;;  %vm396_vm9 = vcmp.lt.s32.totalorder %v1013_v32, 2  ;;  %v403_v10 = vsel %vm395_vm5, %v382_v56, %v385_v60  ;;  %v407_v11 = vsel %vm395_vm5, %v385_v60, %v388_v61 }
  0x45   : > { %v405_v12 = vsel %vm397_vm7, %v388_v61, %v404_v4  ;;  %v486_v13 = vor.u32 %v485_v0, %v484_v62  ;;  %v489_v14 = vor.u32 %v488_v1, %v487_v63  ;;  %v492_v16 = vor.u32 %v491_v3, %v490_v2 }
  0x46   : > { %v409_v17 = vsel %vm397_vm7, %v391_v53, %v408_v8  ;;  %vm499_vm10 = vcmp.lt.s32.totalorder %v1027_v52, 1  ;;  %vm501_vm11 = vcmp.lt.s32.totalorder %v1027_v52, 3  ;;  %v508_v19 = vsel %vm502_vm8, %v495_v6, 920167782 }
  0x47   : > { %v512_v22 = vsel %vm502_vm8, %v498_v9, 1326507024  ;;  %v406_v23 = vsel %vm396_vm9, %v403_v10, %v405_v12  ;;  %v410_v24 = vsel %vm396_vm9, %v407_v11, %v409_v17  ;;  %vm500_vm12 = vcmp.lt.s32.totalorder %v1027_v52, 2 }
  0x48   : > { %v507_v25 = vsel %vm499_vm10, %v486_v13, %v489_v14  ;;  %v509_v26 = vsel %vm501_vm11, %v492_v16, %v508_v19  ;;  %v511_v27 = vsel %vm499_vm10, %v489_v14, %v492_v16  ;;  %v513_v28 = vsel %vm501_vm11, %v495_v6, %v512_v22 }
  0x49   : > { %v379_v30 = vshrl.u32 %v889_v38, %v1010_v29  ;;  %v1074_v33 = vmul.u32.u64.low %v411_v20, %v406_v23  ;;  %v1075_v34 = vmul.u32.u64.high %v411_v20, %v406_v23, %v1074_v33  ;;  %v515_v35 = vshll.u32 %v475_v21, 8 }
  0x4a   : > { %v1077_v36 = vmul.u32.u64.low %v411_v20, %v410_v24  ;;  %v1078_v39 = vmul.u32.u64.high %v411_v20, %v410_v24, %v1077_v36  ;;  %v510_v40 = vsel %vm500_vm12, %v507_v25, %v509_v26  ;;  %v400_v41 = vsel %vm398_vm6, %v388_v61, 2102212464 }
  0x4b   : > { %v514_v42 = vsel %vm500_vm12, %v511_v27, %v513_v28  ;;  %v399_v43 = vsel %vm395_vm5, %v379_v30, %v382_v56  ;;  %v1088_v29 = vmul.u32.u64.low %v515_v35, %v510_v40  ;;  %v1089_v44 = vmul.u32.u64.high %v515_v35, %v510_v40, %v1088_v29 }
  0x4c   : > { %v401_v45 = vsel %vm397_vm7, %v385_v60, %v400_v41  ;;  %v483_v46 = vshrl.u32 %v889_v38, %v1016_v37  ;;  %v1095_v47 = vmul.u32.u64.low %v515_v35, %v514_v42  ;;  %v1096_v48 = vmul.u32.u64.high %v515_v35, %v514_v42, %v1095_v47 }
  0x4d   : > { %v504_v49 = vsel %vm502_vm8, %v492_v16, 2102212464  ;;  %v402_v50 = vsel %vm396_vm9, %v399_v43, %v401_v45  ;;  %v421_v53 = vadd.s32 1, %v1075_v34  ;;  %vm420_vm13 = vc.u32 %v1078_v39, %v1074_v33 }
  0x4e   : > { %v503_v54 = vsel %vm499_vm10, %v483_v46, %v486_v13  ;;  %v505_v55 = vsel %vm501_vm11, %v489_v14, %v504_v49  ;;  %v418_v37 = vmul.u32 %v411_v20, %v402_v50  ;;  %v525_v57 = vadd.s32 1, %v1089_v44 }
  0x4f   : > { %v422_v38 = vsel %vm420_vm13, %v421_v53, %v1075_v34  ;;  %v506_v56 = vsel %vm500_vm12, %v503_v54, %v505_v55  ;;  %vm524_vm14 = vc.u32 %v1096_v48, %v1088_v29  ;;  %v419_v16 = vadd.s32 %v1074_v33, %v1078_v39 }
  0x50   : > { %v423_v32 = vadd.s32 %v422_v38, %v418_v37  ;;  %v522_v58 = vmul.u32 %v515_v35, %v506_v56  ;;  %v526_v59 = vsel %vm524_vm14, %v525_v57, %v1089_v44  ;;  %v523_v24 = vadd.s32 %v1088_v29, %v1096_v48 }
  0x51   : > { %vm455_vm10 = vweird.f32 %v1004_v15  ;;  %vm559_vm12 = vweird.f32 %v1007_v18  ;;  %vm573_vm13 = vcmask 261120  }
  0x52   : > { %v424_v60 = vadd.s32 536870912, %v423_v32  ;;  %v527_v61 = vadd.s32 %v526_v59, %v522_v58 }
  0x54   : > { %v425_v62 = vshrl.u32 %v424_v60, 30  ;;  %v528_v63 = vadd.s32 536870912, %v527_v61 }
  0x56   : > { %v426_v0 = vshll.u32 %v425_v62, 30  ;;  %v529_v1 = vshrl.u32 %v528_v63, 30  ;;  %v449_v53 = vsub.s32 4, %v425_v62 }
  0x58   : > { %v427_v2 = vsub.s32 %v423_v32, %v426_v0  ;;  %v530_v3 = vshll.u32 %v529_v1, 30  ;;  %v450_v54 = vsel %vm365_vm1, %v449_v53, %v425_v62  ;;  %v553_v55 = vsub.s32 4, %v529_v1 }
  0x59   : > { %v452_v37 = vsel %vm1119_vm2, 0, %v450_v54 }
  0x5a   : > { %v429_v4 = vsub.s32 0, %v427_v2  ;;  %v531_v5 = vsub.s32 %v527_v61, %v530_v3  ;;  %v554_v38 = vsel %vm469_vm3, %v553_v55, %v529_v1  ;;  %v456_v51 = vadd.s32 3, %v452_v37 }
  0x5b   : > { %v556_v56 = vsel %vm1129_vm4, 0, %v554_v38 }
  0x5c   : > { %v686_v52 = vmin.u32 %v429_v4, %v427_v2  ;;  %v533_v6 = vsub.s32 0, %v531_v5  ;;  %v457_v58 = vand.u32 3, %v456_v51  ;;  %v560_v59 = vadd.s32 3, %v556_v56 }
  0x5e   : > { %v431_v7 = vclz %v686_v52  ;;  %v690_v8 = vmin.u32 %v533_v6, %v531_v5  ;;  %vm459_vm5 = vcmp.eq.s32.totalorder %v457_v58, 0  ;;  %vm462_vm6 = vcmp.eq.s32.totalorder %v457_v58, 2  ;;  %v679_v52 = vld [vmem:[%s1202_s3] ss:$0 sm:$0xff] }
  0x5f   : > { %v561_v0 = vand.u32 3, %v560_v59  ;;  %vm458_vm7 = vcmp.lt.s32.totalorder %v457_v58, 2 }
  0x60   : > { %v687_v9 = vadd.s32 4294967294, %v431_v7  ;;  %v535_v10 = vclz %v690_v8 }
  0x61   : > { %vm563_vm8 = vcmp.eq.s32.totalorder %v561_v0, 0  ;;  %vm566_vm9 = vcmp.eq.s32.totalorder %v561_v0, 2  ;;  %vm562_vm11 = vcmp.lt.s32.totalorder %v561_v0, 2 }
  0x62   : > { %vm688_vm15 = vcmp.lt.s32.totalorder %v687_v9, 0  ;;  %v691_v11 = vadd.s32 4294967294, %v535_v10 }
  0x63   : > { %v434_v12 = vsel %vm688_vm15, 0, %v687_v9 }
  0x64   : > { %vm692_vm0 = vcmp.lt.s32.totalorder %v691_v11, 0  ;;  %v439_v13 = vsub.s32 4294967266, %v434_v12  ;;  %v435_v17 = vsub.s32 32, %v434_v12  ;;  %v436_v21 = vshll.u32 %v427_v2, %v434_v12 }
  0x65   : > { %v538_v14 = vsel %vm692_vm0, 0, %v691_v11 }
  0x66   : > { %v440_v19 = vadd.s32 127, %v439_v13  ;;  %v543_v20 = vsub.s32 4294967266, %v538_v14  ;;  %v437_v22 = vshrl.u32 %v419_v16, %v435_v17  ;;  %v539_v25 = vsub.s32 32, %v538_v14 }
  0x67   : > { %v540_v30 = vshll.u32 %v531_v5, %v538_v14 }
  0x68   : > { %v441_v23 = vshll.u32 %v440_v19, 23  ;;  %v544_v26 = vadd.s32 127, %v543_v20  ;;  %v438_v27 = vor.u32 %v437_v22, %v436_v21  ;;  %v541_v34 = vshrl.u32 %v523_v24, %v539_v25 }
  0x6a   : > { %v442_v28 = vor.u32 4788187, %v441_v23  ;;  %v545_v35 = vshll.u32 %v544_v26, 23  ;;  %v445_v40 = vcvt.s32.f32 %v438_v27  ;;  %v542_v41 = vor.u32 %v541_v34, %v540_v30 }
  0x6c   : > { %v443_v36 = vand.u32 2147483647, %v442_v28  ;;  %v546_v42 = vor.u32 4788187, %v545_v35  ;;  %v549_v43 = vcvt.s32.f32 %v542_v41 }
  0x6e   : > { %v446_v33 = vmul.f32 %v445_v40, %v443_v36  ;;  %v547_v39 = vand.u32 2147483647, %v546_v42 }
  0x70   : > { %v447_v44 = vxor.u32 2147483648, %v446_v33  ;;  %v550_v45 = vmul.f32 %v549_v43, %v547_v39 }
  0x72   : > { %v448_v46 = vsel %vm365_vm1, %v447_v44, %v446_v33  ;;  %v551_v47 = vxor.u32 2147483648, %v550_v45 }
  0x73   : > { %v451_v48 = vsel %vm1119_vm2, %v1004_v15, %v448_v46 }
  0x74   : > { %v552_v50 = vsel %vm469_vm3, %v551_v47, %v550_v45  ;;  %784 = vcosq.f32 %v451_v48 }
  0x75   : > { %786 = vsinq.f32 %v451_v48  ;;  %v555_v31 = vsel %vm1129_vm4, %v1007_v18, %v552_v50 }
  0x76   : > { %788 = vcosq.f32 %v555_v31 }
  0x77   : > { %790 = vsinq.f32 %v555_v31 }
  0x81   : > { %v785_v57 = vpop.eup %784 }
  0x82   : > { %v787_v32 = vpop.eup %786  ;;  %v463_v63 = vxor.u32 2147483648, %v785_v57 }
  0x83   : > { %v789_v60 = vpop.eup %788  ;;  %v460_v61 = vxor.u32 2147483648, %v787_v32 }
  0x84   : > { %v791_v62 = vpop.eup %790  ;;  %v464_v3 = vsel %vm462_vm6, %v463_v63, %v787_v32  ;;  %v567_v4 = vxor.u32 2147483648, %v789_v60 }
  0x85   : > { %v461_v2 = vsel %vm459_vm5, %v785_v57, %v460_v61  ;;  %v564_v1 = vxor.u32 2147483648, %v791_v62 }
  0x86   : > { %v465_v5 = vsel %vm458_vm7, %v461_v2, %v464_v3  ;;  %v568_v7 = vsel %vm566_vm9, %v567_v4, %v791_v62 }
  0x87   : > { %v565_v6 = vsel %vm563_vm8, %v789_v60, %v564_v1  ;;  %v466_v9 = vsel %vm455_vm10, nan, %v465_v5 }
  0x88   : > { %v569_v11 = vsel %vm562_vm11, %v565_v6, %v568_v7 }
  0x89   : > { %v570_v14 = vsel %vm559_vm12, nan, %v569_v11 }
  0xe8   : > { %v325_v8 = vpop.f32.mrf.mxu0 }
  0xe9   : > { %v326_v10 = vadd.f32 %v679_v52, %v325_v8 }
  0xea   : > { %v706_v12 = vpop.f32.mrf.mxu0 }
  0xeb   : > { %v571_v13 = vadd.f32 %v466_v9, %v326_v10 }
  0xec   : > { %v328_v15 = vpop.f32.mrf.mxu0 }
  0xed   : > { %574 = vst.msk [vmem:[%s249_s16] sm:$0xff] %vm573_vm13, %v571_v13  ;;  %v329_v16 = vadd.f32 %v679_v52, %v328_v15 }
  0xee   : > { %v707_v17 = vpop.f32.mrf.mxu0 }
  0xef   : > { %v572_v18 = vadd.f32 %v570_v14, %v329_v16 }
  0xf1   : > { %575 = vst.msk [vmem:[%s249_s16 + $0x8] sm:$0xff] %vm573_vm13, %v572_v18 }
  0xf2   : > { %817 = shalt.err (!%p814_p10)
}
  0xf3   : > { %s818_s7 = scalar_lea.hbm %s1150_s21, 256  ;;  %s822_s12 = scalar_lea.hbm %s1205_s6, 512 }
  0xf4   : > { %p819_p11 = scmp.ne.s32.totalorder %s1150_s21, %s818_s7  ;;  %p823_p1 = scmp.lt.s32.totalorder %s1150_s21, %s1205_s6 }
  0xf5   : > { %p824_p2 = scmp.lt.s32.totalorder %s822_s12, %s818_s7 }
  0xf6   : > { %p820_p12 = pnand %p819_p11, %p974_p9 }
  0xf7   : > { %p825_p3 = por %p824_p2, %p823_p1 }
  0xf8   : > { %p821_p0 = pneg %p820_p12 }
  0xfa   : > { %p826_p4 = pnand %p825_p3, %p821_p0 }
  0xfc   : > { %829 = shalt.err (!%p826_p4)
}
  0xfd   : > { %s894_s18 = smov 128   ;;  %s895_s19 = smov 8  }
  0xfe   : > { %716 = dma.vmem_to_hbm [thread:$0]  (%p974_p9), %s1152_s17, 256, %s1150_s21, %s1154_s22, %s894_s18, %s894_s18, %s895_s19  }
  0xff PF: > { %p722_p5 = scmp.ge.s32.totalorder %s882_s30, 2  ;;  %s607_s20 = sand.u32 1, %s862_s26  }
 0x100   : > { %s608_s28 = scalar_lea.sflag [#allocation5], %s607_s20 }
 0x101   : > { %p719_p6 = pnand %p722_p5, %p981_p13 }
 0x103   : > { %p720_p7 = pneg %p719_p6 }
 0x105   : > { %857 = dma.done.wait (%p720_p7), %s608_s28, 256  }
 0x106   : > { %859 = vsyncadd (%p720_p7), %s608_s28, 4294967040  ;;  %s25_s30 = sadd.s32 1, %s882_s30   ;;  %s1212_s26 = smov %s866_s27 }
 0x107   : > { %p22_p8 = scmp.ge.s32.totalorder %s25_s30, 4   ;;  %s1213_s27 = smov %s870_s0 }
 0x108   : > { %s1214_s0 = smov %s987_s14  ;;  %s1215_s28 = smov %s878_s29 }
 0x109   : > { %s1216_s29 = smov %s1218_s9  ;;  %24 = sbr.rel (!%p22_p8) target bundleno = 19 (0x13), region = 75 }
 0x10e   :  { %613 = vsyncpa [#allocation5], 1 }
 0x10f   :  { %615 = vsyncpa [#allocation5 + $0x1], 1 }

</bundles_post_ra>
